<compile_context>
chip_gen: v7x
topology: tpu7x:2x2x1
jax: 0.10.0
libtpu: 0.0.40
codegen_flags: <defaults>
</compile_context>

<pallas_src>
import functools

import jax
import jax.numpy as jnp
import numpy as np
from jax import lax
from jax.experimental import pallas as pl
from jax.experimental.pallas import tpu as pltpu

_R = 8        # conv output rows per strip
_PADG = 7     # zero row-groups padded before pooled row 0 in the stage-2 scratch

_ROLL_SIGN = None


def _get_roll_sign():
    """Tiny one-time probe so the kernel is correct for either pltpu.roll
    direction convention (jnp.roll-like or its inverse)."""
    global _ROLL_SIGN
    if _ROLL_SIGN is None:
        def k(x_ref, o_ref):
            o_ref[...] = pltpu.roll(x_ref[...], 1, axis=1)

        x = jax.lax.broadcasted_iota(jnp.float32, (8, 128), 1)
        out = pl.pallas_call(
            k, out_shape=jax.ShapeDtypeStruct((8, 128), jnp.float32))(x)
        # jnp.roll semantics: out[:, 1] == x[:, 0] == 0
        _ROLL_SIGN = 1 if float(out[0, 1]) == 0.0 else -1
    return _ROLL_SIGN


def _split_bf16(w):
    """Exact f32 -> bf16 hi/lo split (w ~= hi + lo)."""
    hi = w.astype(jnp.bfloat16)
    lo = (w - hi.astype(jnp.float32)).astype(jnp.bfloat16)
    return hi, lo


# ----------------------------------------------------------------------------
# fused kernel: conv1+relu+pool -> conv2+relu+pool -> fc1, one batch element
# ----------------------------------------------------------------------------
def _kernel(x_ref, w1h, w1l, b1c, w2h, w2l, b2c, masks, wfc, bfc,
            out_ref, y1pad, *, C, H, W, OC1, OC2, roll_sign):
    R = _R
    H2 = H // 2
    f32, bf16 = jnp.float32, jnp.bfloat16

    def rollW(v, s):  # lane rotation by s (logical jnp.roll direction)
        return pltpu.roll(v, (roll_sign * s) % W, axis=1)

    def dot3(wh, wl, s_hi, s_lo):  # ~f32-accurate matmul via 3 bf16 passes
        return (jnp.dot(wh, s_hi, preferred_element_type=f32)
                + jnp.dot(wh, s_lo, preferred_element_type=f32)
                + jnp.dot(wl, s_hi, preferred_element_type=f32))

    # zero the vertical zero-padding row-groups of the pooled-feature scratch
    y1pad[0:_PADG * OC1, :] = jnp.zeros((_PADG * OC1, W), f32)
    y1pad[(H2 + _PADG) * OC1:(H2 + _PADG + 1) * OC1, :] = jnp.zeros((OC1, W), f32)

    m1L = masks[0:1, :]   # zero lane 0          (stage-1 kw=0 edge)
    m1R = masks[1:2, :]   # zero lane W-1        (stage-1 kw=2 edge)
    m2L = masks[2:3, :]   # zero lanes 0,1       (stage-2 kw=0 edge, sparse lanes)
    m2R = masks[3:4, :]   # zero lanes W-2,W-1   (stage-2 kw=2 edge, sparse lanes)
    bias1 = b1c[...]      # (OC1*R, 1)
    bias2 = b2c[...]      # (OC2*R, 1)

    M1 = OC1 * R
    M2 = OC2 * R

    # -------- stage 1: conv1 + relu + 2x2 pool, written to VMEM scratch --------
    for y0 in range(0, H, R):
        # per-channel 24-row aligned windows [y0-8, y0+16) with zero vertical pad
        pieces = []
        for c in range(C):
            if y0 == 0:
                blk = jnp.concatenate(
                    [jnp.zeros((R, W), f32), x_ref[c, 0:2 * R, :]], axis=0)
            elif y0 == H - R:
                blk = jnp.concatenate(
                    [x_ref[c, y0 - R:y0 + R, :], jnp.zeros((R, W), f32)], axis=0)
            else:
                blk = x_ref[c, y0 - R:y0 + 2 * R, :]
            pieces.append(blk)
        slab = jnp.concatenate(pieces, axis=0)              # (C*24, W) f32
        s_hi = slab.astype(bf16)
        s_lo = (slab - s_hi.astype(f32)).astype(bf16)

        out = dot3(w1h[M1:2 * M1, :], w1l[M1:2 * M1, :], s_hi, s_lo) + bias1
        a0 = dot3(w1h[0:M1, :], w1l[0:M1, :], s_hi, s_lo)
        out = out + m1L * rollW(a0, 1)
        a2 = dot3(w1h[2 * M1:3 * M1, :], w1l[2 * M1:3 * M1, :], s_hi, s_lo)
        out = out + m1R * rollW(a2, -1)                      # (OC1*R, W)

        for k in range(R // 2):
            top = out[(2 * k) * OC1:(2 * k + 1) * OC1, :]
            bot = out[(2 * k + 1) * OC1:(2 * k + 2) * OC1, :]
            rm = jnp.maximum(top, bot)                       # row pool
            cm = jnp.maximum(rm, rollW(rm, -1))              # col pool (even lanes)
            pooled = jnp.maximum(cm, 0.0)                    # relu
            g = y0 // 2 + k + _PADG
            y1pad[g * OC1:(g + 1) * OC1, :] = pooled         # aligned (8, W) store

    # -------- stage 2: conv2 + relu + 2x2 pool + fc1, on the sparse layout -----
    acc = jnp.zeros((OC2, W), f32)
    for z0 in range(0, H2, R):
        slab = y1pad[z0 * OC1:(z0 + 2 * R) * OC1, :]         # (16*OC1, W) f32
        s_hi = slab.astype(bf16)
        s_lo = (slab - s_hi.astype(f32)).astype(bf16)

        out = dot3(w2h[M2:2 * M2, :], w2l[M2:2 * M2, :], s_hi, s_lo) + bias2
        a0 = dot3(w2h[0:M2, :], w2l[0:M2, :], s_hi, s_lo)
        out = out + m2L * rollW(a0, 2)
        a2 = dot3(w2h[2 * M2:3 * M2, :], w2l[2 * M2:3 * M2, :], s_hi, s_lo)
        out = out + m2R * rollW(a2, -2)                      # (OC2*R, W) sparse

        for k in range(R // 2):
            top = out[(2 * k) * OC2:(2 * k + 1) * OC2, :]
            bot = out[(2 * k + 1) * OC2:(2 * k + 2) * OC2, :]
            rm = jnp.maximum(top, bot)
            cm = jnp.maximum(rm, rollW(rm, -2))              # valid at lanes 0 mod 4
            pooled = jnp.maximum(cm, 0.0)
            q = z0 // 2 + k
            acc = acc + pooled * wfc[q]                      # fc partial products

    out_ref[0] = jnp.sum(acc) + bfc[0]


# ----------------------------------------------------------------------------
# wrapper: weight packing + pallas_call
# ----------------------------------------------------------------------------
@functools.partial(jax.jit, static_argnums=(7,))
def _forward_jit(x, w1, b1, w2, b2, wfc, bfc, roll_sign):
    N, C, H, W = x.shape
    OC1, OC2, R = 8, 16, _R
    H2, H4, W4 = H // 2, H // 4, W // 4
    f32 = jnp.float32

    # conv1 packed as (3*OC1*R, C*24): rows = (kw, r, oc), cols = (c, window-row)
    w1t = jnp.transpose(w1.astype(f32), (3, 0, 1, 2))        # (kw, oc, c, kh)
    Wc1 = jnp.zeros((3, R, OC1, C, 3 * R), f32)
    for r in range(R):
        for kh in range(3):
            Wc1 = Wc1.at[:, r, :, :, r + kh + 7].set(w1t[:, :, :, kh])
    Wc1 = Wc1.reshape(3 * R * OC1, C * 3 * R)
    w1h, w1l = _split_bf16(Wc1)

    # conv2 packed as (3*OC2*R, 16*OC1): rows = (kw, r, oc), cols = (window-row, c)
    w2t = jnp.transpose(w2.astype(f32), (3, 0, 1, 2))        # (kw, oc, c, kh)
    Wc2 = jnp.zeros((3, R, OC2, 2 * R, OC1), f32)
    for r in range(R):
        for kh in range(3):
            Wc2 = Wc2.at[:, r, :, r + kh + 6, :].set(w2t[:, :, :, kh])
    Wc2 = Wc2.reshape(3 * R * OC2, 2 * R * OC1)
    w2h, w2l = _split_bf16(Wc2)

    b1c = jnp.tile(b1.astype(f32), (R,)).reshape(R * OC1, 1)
    b2c = jnp.tile(b2.astype(f32), (R,)).reshape(R * OC2, 1)

    lane = jnp.arange(W)
    masks = jnp.stack([lane != 0, lane != W - 1, lane >= 2, lane < W - 2],
                      axis=0).astype(f32)                    # (4, W)

    # fc1 weights expanded onto the sparse lane layout (valid lanes = 4*j)
    wfc_t = jnp.transpose(wfc.reshape(OC2, H4, W4).astype(f32), (1, 0, 2))
    wfc_exp = jnp.zeros((H4, OC2, W), f32).at[:, :, 0::4].set(wfc_t)
    bfc = bfc.astype(f32).reshape(1)

    kern = functools.partial(_kernel, C=C, H=H, W=W, OC1=OC1, OC2=OC2,
                             roll_sign=roll_sign)
    return pl.pallas_call(
        kern,
        out_shape=jax.ShapeDtypeStruct((N, 1), jnp.float32),
        grid=(N,),
        in_specs=[
            pl.BlockSpec((None, C, H, W), lambda n: (n, 0, 0, 0)),  # input plane
            pl.BlockSpec(w1h.shape, lambda n: (0, 0)),
            pl.BlockSpec(w1l.shape, lambda n: (0, 0)),
            pl.BlockSpec(b1c.shape, lambda n: (0, 0)),
            pl.BlockSpec(w2h.shape, lambda n: (0, 0)),
            pl.BlockSpec(w2l.shape, lambda n: (0, 0)),
            pl.BlockSpec(b2c.shape, lambda n: (0, 0)),
            pl.BlockSpec(masks.shape, lambda n: (0, 0)),
            pl.BlockSpec(wfc_exp.shape, lambda n: (0, 0, 0)),
            pl.BlockSpec(memory_space=pltpu.MemorySpace.SMEM),      # fc bias
        ],
        out_specs=pl.BlockSpec((None, 1), lambda n: (n, 0)),
        scratch_shapes=[
            pltpu.VMEM(((H2 + 2 * _PADG - 6) * OC1, W), jnp.float32),  # (1088, W)
        ],
        compiler_params=pltpu.CompilerParams(
            dimension_semantics=("parallel",),
            vmem_limit_bytes=32 * 1024 * 1024),
    )(x, w1h, w1l, b1c, w2h, w2l, b2c, masks, wfc_exp, bfc)


def resize_cnn_forward(x, params):
    w1, b1, w2, b2, wfc, bfc = params
    out = _forward_jit(x, w1, b1, w2, b2, wfc, bfc, _get_roll_sign())
    # The PyTorch module applies the *same* fc1 twice -> identical outputs.
    return {"label_width": out, "label_height": out}


# ----------------------------------------------------------------------------
# parameters + pure-JAX reference (for validation)
# ----------------------------------------------------------------------------
def init_params(key, in_channels, h4, w4):
    ks = jax.random.split(key, 6)
    w1 = jax.random.normal(ks[0], (8, in_channels, 3, 3), jnp.float32) * 0.1
    b1 = jax.random.normal(ks[1], (8,), jnp.float32) * 0.1
    w2 = jax.random.normal(ks[2], (16, 8, 3, 3), jnp.float32) * 0.05
    b2 = jax.random.normal(ks[3], (16,), jnp.float32) * 0.05
    fan_in = 16 * h4 * w4
    wfc = jax.random.normal(ks[4], (1, fan_in), jnp.float32) / np.sqrt(fan_in)
    bfc = jax.random.normal(ks[5], (1,), jnp.float32) * 0.1
    return (w1, b1, w2, b2, wfc, bfc)


def reference_forward(x, params):
    w1, b1, w2, b2, wfc, bfc = params

    def conv(x, w, b):
        y = lax.conv_general_dilated(
            x, w, window_strides=(1, 1), padding=((1, 1), (1, 1)),
            dimension_numbers=("NCHW", "OIHW", "NCHW"),
            precision=lax.Precision.HIGHEST)
        return jax.nn.relu(y + b[None, :, None, None])

    def pool(x):
        return lax.reduce_window(x, -jnp.inf, lax.max,
                                 (1, 1, 2, 2), (1, 1, 2, 2), "VALID")

    y = pool(conv(x, w1, b1))
    y = pool(conv(y, w2, b2))
    flat = y.reshape(y.shape[0], -1)
    return jnp.dot(flat, wfc.T, precision=lax.Precision.HIGHEST) + bfc


if __name__ == "__main__":
    key = jax.random.PRNGKey(0)
    kx, kp = jax.random.split(key)

    # fc1 hard-codes 16*64*64 inputs, which forces a 256x256 spatial input
    # (two 2x2 pools: 256 -> 128 -> 64).  Keep batch/channels small.
    N, C, H, W = 2, 3, 256, 256
    x = jax.random.normal(kx, (N, C, H, W), jnp.float32)
    params = init_params(kp, C, H // 4, W // 4)

    out = resize_cnn_forward(x, params)
    out = jax.block_until_ready(out)

    ref = np.asarray(reference_forward(x, params))
    np.testing.assert_allclose(np.asarray(out["label_width"]), ref,
                               rtol=1e-3, atol=1e-3)
    np.testing.assert_allclose(np.asarray(out["label_height"]), ref,
                               rtol=1e-3, atol=1e-3)
    assert out["label_width"].shape == (N, 1)
    print("KERNEL_OK")
</pallas_src>

<mosaic_0001>
module attributes {stable_mosaic.version = 11 : i64} {
  func.func @k(%arg0: memref<8x128xf32, #tpu.memory_space<vmem>>, %arg1: memref<8x128xf32, #tpu.memory_space<vmem>>) attributes {dimension_semantics = [], scalar_prefetch = 0 : i64, scratch_operands = 0 : i64, tpu.core_type = #tpu.core_type<tc>} {
    %c0 = arith.constant 0 : index
    %c0_0 = arith.constant 0 : index
    %0 = vector.load %arg0[%c0, %c0_0] : memref<8x128xf32, #tpu.memory_space<vmem>>, vector<8x128xf32>
    %c1_i32 = arith.constant 1 : i32
    %1 = tpu.dynamic_rotate %0 by %c1_i32 dim 1 : vector<8x128xf32>, i32 -> vector<8x128xf32>
    %c0_1 = arith.constant 0 : index
    %c0_2 = arith.constant 0 : index
    %2 = vector.load %arg1[%c0_1, %c0_2] : memref<8x128xf32, #tpu.memory_space<vmem>>, vector<8x128xf32>
    tpu.vector_store %arg1[%c0_1, %c0_2], %1 {strides = array<i32>} : memref<8x128xf32, #tpu.memory_space<vmem>>, vector<8x128xf32>,
    return
  }
}

</mosaic_0001>

<bundles_post_ra>
// kernel: tpu_custom_call.1
= control target key start
LH: loop header
LB: loop body
LE: loop exit
PB: predicated region body
PF: predicated region fallthrough
CT: control target
= control target key end

     0   :  { %6 = vsyncpa [#allocation3], 0  ;;  %s128_s0 = inlined_call_operand.hbm [shape: f32[8,128], index: 0, kind: input, shape index: {}]   ;;  %s129_s1 = inlined_call_operand.hbm [shape: f32[8,128], index: 1, kind: output, shape index: {}]  }
   0x1   :  { %7 = vsyncpa [#allocation4], 0  ;;  %s91_s6 = smov [#allocation2]   ;;  %s43_s10 = scalar_lea.hbm %s128_s0, 128 }
   0x2   :  { %s14_s7 = sshll.u32 %s91_s6, 4  ;;  %p44_p0 = scmp.ne.s32.totalorder %s128_s0, %s43_s10  ;;  %s15_s7 = int_to_ptr.vmem [resolvable:$true] %s14_s7 }
   0x3   :  { %p47_p1 = scmp.lt.u32.totalorder %s43_s10, %s128_s0 }
   0x5   :  { %p49_p2 = pnand %p47_p1, %p44_p0 }
   0x7   :  { %52 = shalt.err (!%p49_p2)
}
   0x8   :  { %s53_s15 = scalar_lea.vmem %s15_s7, 128  ;;  %p58_p4 = scmp.lt.s32.totalorder %s15_s7, %s15_s7 }
   0x9   :  { %p54_p3 = scmp.ne.s32.totalorder %s15_s7, %s53_s15  ;;  %p59_p5 = scmp.lt.s32.totalorder %s53_s15, %s53_s15 }
   0xb   :  { %p60_p6 = por %p59_p5, %p58_p4 }
   0xd   :  { %p61_p7 = pnand %p60_p6, %p54_p3 }
   0xf   :  { %64 = shalt.err (!%p61_p7)
}
  0x10   :  { %17 = dma.hbm_to_vmem [thread:$0]  %s128_s0, 128, %s15_s7, [#allocation3]  }
  0x11   :  { %87 = dma.done.wait [#allocation3], 128  }
  0x12   :  { %88 = vsyncadd [#allocation3], 4294967168  ;;  %v21_v0 = vld [vmem:[#allocation2] sm:$0xff]  ;;  %s92_s18 = smov 1   ;;  %s93_s19 = smov [#allocation5]  }
  0x13   :  { %22 = vrot.lane.b32.xlu0 %v21_v0, %s92_s18  ;;  %s31_s20 = sshll.u32 %s93_s19, 4  ;;  %s32_s20 = int_to_ptr.vmem [resolvable:$true] %s31_s20 }
  0x14   :  { %s65_s21 = scalar_lea.vmem %s32_s20, 128  ;;  %p70_p9 = scmp.lt.s32.totalorder %s32_s20, %s32_s20 }
  0x15   :  { %p66_p8 = scmp.ne.s32.totalorder %s32_s20, %s65_s21  ;;  %p71_p10 = scmp.lt.s32.totalorder %s65_s21, %s65_s21 }
  0x17   :  { %p72_p11 = por %p71_p10, %p70_p9 }
  0x19   :  { %p73_p12 = pnand %p72_p11, %p66_p8 }
  0x85   :  { %v23_v1 = vpop.permute.xlu0 %22 }
  0x86   :  { %24 = vst [vmem:[#allocation5] sm:$0xff] %v23_v1 }
  0x87   :  { %76 = shalt.err (!%p73_p12)
}
  0x88   :  { %s77_s0 = scalar_lea.hbm %s129_s1, 128 }
  0x89   :  { %p78_p13 = scmp.ne.s32.totalorder %s129_s1, %s77_s0  ;;  %p81_p0 = scmp.lt.u32.totalorder %s77_s0, %s129_s1 }
  0x8b   :  { %p83_p1 = pnand %p81_p0, %p78_p13 }
  0x8d   :  { %86 = shalt.err (!%p83_p1)
}
  0x8e   :  { %34 = dma.vmem_to_hbm [thread:$0]  %s32_s20, 128, %s129_s1, [#allocation4]  }
  0x8f   :  { %89 = dma.done.wait [#allocation4], 128  }
  0x90   :  { %90 = vsyncadd [#allocation4], 4294967168 }
  0x91   :  { %38 = vsyncpa [#allocation3], 1 }
  0x92   :  { %39 = vsyncpa [#allocation4], 1 }

</bundles_post_ra>
